<compile_context>
chip_gen: v6e
topology: v6e:2x2x1
jax: 0.10.0
libtpu: 0.0.40
codegen_flags: <defaults>
</compile_context>

<pallas_src>
import numpy as np
import jax
import jax.numpy as jnp
from jax.experimental import pallas as pl
from jax.experimental.pallas import tpu as pltpu


# ---------------------------------------------------------------------------
# Host-side constant prep
# ---------------------------------------------------------------------------
def _bilinear_matrix(n_in, n_out):
    """1-D bilinear interpolation matrix U (n_out, n_in), align_corners=True
    (matches nn.UpsamplingBilinear2d)."""
    U = np.zeros((n_out, n_in), np.float32)
    if n_in == 1 or n_out == 1:
        U[:, 0] = 1.0
        return jnp.asarray(U)
    src = np.arange(n_out, dtype=np.float64) * (n_in - 1) / (n_out - 1)
    lo = np.clip(np.floor(src).astype(np.int64), 0, n_in - 1)
    hi = np.minimum(lo + 1, n_in - 1)
    frac = (src - lo).astype(np.float32)
    rows = np.arange(n_out)
    U[rows, lo] += 1.0 - frac
    U[rows, hi] += frac
    return jnp.asarray(U)


def _tap_matrices(w_hwio, U_w):
    """Fold (3x3 taps along W) + (Cin->Cout mixing) + (W bilinear interp) into a single
    matrix Gcat of shape (3*W*Cin, Wo*Cout), rows ordered [ky=0 | ky=1 | ky=2]:
      Gcat[ky*W*Cin + w_in*Cin + ci, o*Cout + co] =
          sum_{kx, w_out: w_out+kx-1 == w_in} U_w[o, w_out] * w_hwio[ky, kx, ci, co]
    (padding=1 along W is implicit: out-of-range input columns simply don't appear)."""
    KH, KW, Cin, Cout = w_hwio.shape
    Wo, W = U_w.shape
    gs = []
    for ky in range(KH):
        T = jnp.zeros((W, Cin, Wo, Cout), jnp.float32)
        for kx in range(KW):
            # contrib[w_out, ci, o, co] = U_w[o, w_out] * w[ky, kx, ci, co]
            contrib = jnp.einsum("ow,ic->wioc", U_w, w_hwio[ky, kx])
            d = kx - 1                                  # w_in = w_out + d
            lo, hi = max(0, -d), min(W, W - d)          # valid w_out range
            T = T.at[lo + d:hi + d].add(contrib[lo:hi])
        gs.append(T.reshape(W * Cin, Wo * Cout))
    return jnp.concatenate(gs, axis=0)                  # (3*W*Cin, Wo*Cout)


# ---------------------------------------------------------------------------
# Pallas kernel: one batch element per grid step, fully fused
# ---------------------------------------------------------------------------
def _upsample_bilinear_kernel(x_ref, g_ref, uh_ref, b_ref, out_ref):
    # Build the K-concatenated operand straight from x_ref (no halo scratch, no
    # per-step zero-fill): padding=1 along H is two in-register zero rows.
    x = x_ref[0].astype(jnp.bfloat16)                       # (H, W*Cin)
    zero_row = jnp.zeros((1, x.shape[1]), jnp.bfloat16)
    top = jnp.concatenate([zero_row, x[:-1, :]], axis=0)    # padded row h-1 (ky=0)
    bot = jnp.concatenate([x[1:, :], zero_row], axis=0)     # padded row h+1 (ky=2)
    xp3 = jnp.concatenate([top, x, bot], axis=1)            # (H, 3*W*Cin)

    # ONE MXU matmul: 3x3 conv + Cin->Cout mixing + W-direction bilinear interp.
    acc = jnp.dot(xp3, g_ref[...], preferred_element_type=jnp.float32)   # (H, Wo*Cout)

    # H-direction bilinear interp, then bias + ReLU (interp weights sum to 1, so
    # adding the conv bias after interpolation is exact).
    up = jnp.dot(uh_ref[...], acc.astype(jnp.bfloat16),
                 preferred_element_type=jnp.float32)        # (Ho, Wo*Cout)
    up = jnp.maximum(up + b_ref[...], 0.0)
    out_ref[0] = up.astype(out_ref.dtype)                   # lane-dense store


# ---------------------------------------------------------------------------
# Wrapper (PyTorch-style NCHW in / NCHW out, OIHW weights)
# ---------------------------------------------------------------------------
def upsample_block_bilinear(x_nchw, weight_oihw, bias, up_scale=2):
    N, Cin, H, W = x_nchw.shape
    Cout = weight_oihw.shape[0]
    r = int(up_scale)
    Ho, Wo = r * H, r * W
    WC, WoC = W * Cin, Wo * Cout

    # Layout prep (cheap, host side): NCHW -> NHWC -> lane-packed (N, H, W*Cin).
    x2d = jnp.transpose(x_nchw, (0, 2, 3, 1)).reshape(N, H, WC)
    w_hwio = jnp.transpose(weight_oihw, (2, 3, 1, 0)).astype(jnp.float32)

    U_h = _bilinear_matrix(H, Ho).astype(jnp.bfloat16)          # (Ho, H)
    U_w = _bilinear_matrix(W, Wo)                               # (Wo, W)
    G = _tap_matrices(w_hwio, U_w).astype(jnp.bfloat16)         # (3*WC, WoC)
    b_row = jnp.tile(bias.astype(jnp.float32), Wo).reshape(1, WoC)

    # Scoped-VMEM budget from the actual footprint (+ headroom), per perf review.
    dbl_bytes = 2 * (H * WC * x2d.dtype.itemsize + Ho * WoC * x_nchw.dtype.itemsize)
    inv_bytes = G.size * 2 + U_h.size * 2 + b_row.size * 4
    vmem_limit = int(min(112 * 2**20, 2 * (dbl_bytes + inv_bytes) + (8 << 20)))

    def _build_and_call(single_buffer_invariants):
        def const_spec(shape):
            idx = lambda n, _nd=len(shape): (0,) * _nd
            if single_buffer_invariants:
                return pl.BlockSpec(shape, idx, pipeline_mode=pl.Buffered(1))
            return pl.BlockSpec(shape, idx)

        return pl.pallas_call(
            _upsample_bilinear_kernel,
            out_shape=jax.ShapeDtypeStruct((N, Ho, WoC), x_nchw.dtype),
            grid_spec=pltpu.PrefetchScalarGridSpec(
                num_scalar_prefetch=0,
                grid=(N,),
                in_specs=[
                    pl.BlockSpec((1, H, WC), lambda n: (n, 0, 0)),
                    const_spec((3 * WC, WoC)),          # Gcat  (grid-invariant)
                    const_spec((Ho, H)),                # U_h   (grid-invariant)
                    const_spec((1, WoC)),               # bias  (grid-invariant)
                ],
                out_specs=pl.BlockSpec((1, Ho, WoC), lambda n: (n, 0, 0)),
            ),
            compiler_params=pltpu.CompilerParams(
                dimension_semantics=("parallel",),
                vmem_limit_bytes=vmem_limit),
        )(x2d, G, U_h, b_row)

    try:
        out2d = _build_and_call(True)
    except Exception:
        # Fallback: default double-buffering if per-BlockSpec pipeline_mode is
        # unsupported in this Pallas build (only costs extra VMEM for invariants).
        out2d = _build_and_call(False)

    out_nhwc = out2d.reshape(N, Ho, Wo, Cout)            # free row-major reshape
    return jnp.transpose(out_nhwc, (0, 3, 1, 2))         # NCHW for PyTorch parity


# ---------------------------------------------------------------------------
# Pure-JAX reference (independent code path: XLA conv + gather-based bilinear)
# ---------------------------------------------------------------------------
def _reference(x_nchw, weight_oihw, bias, up_scale):
    y = jax.lax.conv_general_dilated(
        x_nchw, weight_oihw, (1, 1), "SAME",
        dimension_numbers=("NCHW", "OIHW", "NCHW")) + bias[None, :, None, None]
    N, C, H, W = y.shape
    Ho, Wo = H * up_scale, W * up_scale
    ys = jnp.arange(Ho) * (H - 1) / (Ho - 1)
    xs = jnp.arange(Wo) * (W - 1) / (Wo - 1)
    y0 = jnp.floor(ys).astype(jnp.int32); y1 = jnp.minimum(y0 + 1, H - 1)
    x0 = jnp.floor(xs).astype(jnp.int32); x1 = jnp.minimum(x0 + 1, W - 1)
    wy = (ys - y0)[None, None, :, None]
    wx = (xs - x0)[None, None, None, :]
    gather = lambda ri, ci: y[:, :, ri, :][:, :, :, ci]
    top = gather(y0, x0) * (1 - wx) + gather(y0, x1) * wx
    bot = gather(y1, x0) * (1 - wx) + gather(y1, x1) * wx
    return jnp.maximum(top * (1 - wy) + bot * wy, 0.0)


if __name__ == "__main__":
    key = jax.random.PRNGKey(0)
    N, Cin, H, W = 2, 4, 16, 16
    Cout, up_scale = 8, 2

    kx_, kw_, kb_ = jax.random.split(key, 3)
    x = jax.random.normal(kx_, (N, Cin, H, W), dtype=jnp.float32)
    fan_in = Cin * 3 * 3
    w = jax.random.normal(kw_, (Cout, Cin, 3, 3), dtype=jnp.float32) / jnp.sqrt(fan_in)
    b = jax.random.normal(kb_, (Cout,), dtype=jnp.float32) * 0.1

    out = upsample_block_bilinear(x, w, b, up_scale=up_scale)
    out = jax.block_until_ready(out)

    ref = _reference(x, w, b, up_scale)
    assert out.shape == (N, Cout, up_scale * H, up_scale * W), out.shape
    # bf16 MXU operands (per perf review) -> loosened tolerance; accumulation is f32.
    max_diff = jnp.max(jnp.abs(out - ref))
    assert jnp.allclose(out, ref, atol=5e-2, rtol=5e-2), \
        f"mismatch vs JAX reference, max abs diff {max_diff}"

    print("KERNEL_OK")
</pallas_src>

<mosaic_0001>
module attributes {stable_mosaic.version = 11 : i64} {
  func.func @_upsample_bilinear_kernel(%arg0: i32, %arg1: memref<1x16x64xf32, #tpu.memory_space<vmem>>, %arg2: memref<192x256xbf16, #tpu.memory_space<vmem>>, %arg3: memref<32x16xbf16, #tpu.memory_space<vmem>>, %arg4: memref<1x256xf32, #tpu.memory_space<vmem>>, %arg5: memref<1x32x256xf32, #tpu.memory_space<vmem>>) attributes {dimension_semantics = [#tpu.dimension_semantics<parallel>], iteration_bounds = array<i64: 2>, scalar_prefetch = 0 : i64, scratch_operands = 0 : i64, tpu.core_type = #tpu.core_type<tc>, window_params = [{transform_indices = @transform_0, window_bounds = array<i64: 1, 16, 64>}, {pipeline_mode = #tpu.pipeline_mode<synchronous>, transform_indices = @transform_1, window_bounds = array<i64: 192, 256>}, {pipeline_mode = #tpu.pipeline_mode<synchronous>, transform_indices = @transform_2, window_bounds = array<i64: 32, 16>}, {pipeline_mode = #tpu.pipeline_mode<synchronous>, transform_indices = @transform_3, window_bounds = array<i64: 1, 256>}, {transform_indices = @transform_4, window_bounds = array<i64: 1, 32, 256>}]} {
    %c0 = arith.constant 0 : index
    %c0_0 = arith.constant 0 : index
    %c0_1 = arith.constant 0 : index
    %0 = vector.load %arg1[%c0, %c0_0, %c0_1] : memref<1x16x64xf32, #tpu.memory_space<vmem>>, vector<1x16x64xf32>
    %1 = vector.shape_cast %0 : vector<1x16x64xf32> to vector<16x64xf32>
    %2 = arith.truncf %1 : vector<16x64xf32> to vector<16x64xbf16>
    %cst = arith.constant 0.000000e+00 : bf16
    %3 = vector.broadcast %cst : bf16 to vector<1x64xbf16>
    %4 = vector.extract_strided_slice %2 {offsets = [0, 0], sizes = [15, 64], strides = [1, 1]} : vector<16x64xbf16> to vector<15x64xbf16>
    %5 = tpu.concatenate %3, %4 in 0 : vector<1x64xbf16>, vector<15x64xbf16> -> vector<16x64xbf16>
    %6 = vector.extract_strided_slice %2 {offsets = [1, 0], sizes = [15, 64], strides = [1, 1]} : vector<16x64xbf16> to vector<15x64xbf16>
    %7 = tpu.concatenate %6, %3 in 0 : vector<15x64xbf16>, vector<1x64xbf16> -> vector<16x64xbf16>
    %8 = tpu.concatenate %5, %2, %7 in 1 : vector<16x64xbf16>, vector<16x64xbf16>, vector<16x64xbf16> -> vector<16x192xbf16>
    %c0_2 = arith.constant 0 : index
    %c0_3 = arith.constant 0 : index
    %9 = vector.load %arg2[%c0_2, %c0_3] : memref<192x256xbf16, #tpu.memory_space<vmem>>, vector<192x256xbf16>
    %cst_4 = arith.constant dense<0.000000e+00> : vector<16x256xf32>
    %10 = tpu.matmul %8, %9, %cst_4 {dimension_numbers = #tpu.dot_dimension_numbers<[1], [0], [0], [1], [0, 0, 1, 1], [], []>} : vector<16x192xbf16>, vector<192x256xbf16>, vector<16x256xf32> -> vector<16x256xf32>
    %c0_5 = arith.constant 0 : index
    %c0_6 = arith.constant 0 : index
    %11 = vector.load %arg3[%c0_5, %c0_6] : memref<32x16xbf16, #tpu.memory_space<vmem>>, vector<32x16xbf16>
    %12 = arith.truncf %10 : vector<16x256xf32> to vector<16x256xbf16>
    %cst_7 = arith.constant dense<0.000000e+00> : vector<32x256xf32>
    %13 = tpu.matmul %11, %12, %cst_7 {dimension_numbers = #tpu.dot_dimension_numbers<[1], [0], [0], [1], [0, 0, 1, 1], [], []>} : vector<32x16xbf16>, vector<16x256xbf16>, vector<32x256xf32> -> vector<32x256xf32>
    %c0_8 = arith.constant 0 : index
    %c0_9 = arith.constant 0 : index
    %14 = vector.load %arg4[%c0_8, %c0_9] : memref<1x256xf32, #tpu.memory_space<vmem>>, vector<1x256xf32>
    %15 = vector.broadcast %14 : vector<1x256xf32> to vector<32x256xf32>
    %16 = arith.addf %13, %15 : vector<32x256xf32>
    %cst_10 = arith.constant 0.000000e+00 : f32
    %17 = vector.broadcast %cst_10 : f32 to vector<32x256xf32>
    %18 = arith.maximumf %16, %17 : vector<32x256xf32>
    %c0_11 = arith.constant 0 : index
    %c0_12 = arith.constant 0 : index
    %c0_13 = arith.constant 0 : index
    %19 = vector.load %arg5[%c0_11, %c0_12, %c0_13] : memref<1x32x256xf32, #tpu.memory_space<vmem>>, vector<1x32x256xf32>
    %20 = vector.shape_cast %19 : vector<1x32x256xf32> to vector<32x256xf32>
    %21 = vector.shape_cast %18 : vector<32x256xf32> to vector<1x32x256xf32>
    tpu.vector_store %arg5[%c0_11, %c0_12, %c0_13], %21 {strides = array<i32>} : memref<1x32x256xf32, #tpu.memory_space<vmem>>, vector<1x32x256xf32>,
    return
  }
  func.func @transform_0(%arg0: i32) -> (i32, i32, i32) {
    %c0_i32 = arith.constant 0 : i32
    %c0_i32_0 = arith.constant 0 : i32
    %c0_i32_1 = arith.constant 0 : i32
    return %arg0, %c0_i32, %c0_i32_0 : i32, i32, i32
  }
  func.func @transform_1(%arg0: i32) -> (i32, i32) {
    %c0_i32 = arith.constant 0 : i32
    %c0_i32_0 = arith.constant 0 : i32
    %c0_i32_1 = arith.constant 0 : i32
    return %c0_i32, %c0_i32_0 : i32, i32
  }
  func.func @transform_2(%arg0: i32) -> (i32, i32) {
    %c0_i32 = arith.constant 0 : i32
    %c0_i32_0 = arith.constant 0 : i32
    %c0_i32_1 = arith.constant 0 : i32
    return %c0_i32, %c0_i32_0 : i32, i32
  }
  func.func @transform_3(%arg0: i32) -> (i32, i32) {
    %c0_i32 = arith.constant 0 : i32
    %c0_i32_0 = arith.constant 0 : i32
    %c0_i32_1 = arith.constant 0 : i32
    return %c0_i32, %c0_i32_0 : i32, i32
  }
  func.func @transform_4(%arg0: i32) -> (i32, i32, i32) {
    %c0_i32 = arith.constant 0 : i32
    %c0_i32_0 = arith.constant 0 : i32
    %c0_i32_1 = arith.constant 0 : i32
    return %arg0, %c0_i32, %c0_i32_0 : i32, i32, i32
  }
}

module attributes {stable_mosaic.version = 11 : i64} {
  func.func @_upsample_bilinear_kernel(%arg0: i32, %arg1: memref<1x16x64xf32, #tpu.memory_space<vmem>>, %arg2: memref<192x256xbf16, #tpu.memory_space<vmem>>, %arg3: memref<32x16xbf16, #tpu.memory_space<vmem>>, %arg4: memref<1x256xf32, #tpu.memory_space<vmem>>, %arg5: memref<1x32x256xf32, #tpu.memory_space<vmem>>) attributes {dimension_semantics = [#tpu.dimension_semantics<parallel>], iteration_bounds = array<i64: 2>, scalar_prefetch = 0 : i64, scratch_operands = 0 : i64, tpu.core_type = #tpu.core_type<tc>, window_params = [{transform_indices = @transform_0, window_bounds = array<i64: 1, 16, 64>}, {pipeline_mode = #tpu.pipeline_mode<synchronous>, transform_indices = @transform_1, window_bounds = array<i64: 192, 256>}, {pipeline_mode = #tpu.pipeline_mode<synchronous>, transform_indices = @transform_2, window_bounds = array<i64: 32, 16>}, {pipeline_mode = #tpu.pipeline_mode<synchronous>, transform_indices = @transform_3, window_bounds = array<i64: 1, 256>}, {transform_indices = @transform_4, window_bounds = array<i64: 1, 32, 256>}]} {
    %c0 = arith.constant 0 : index
    %c0_0 = arith.constant 0 : index
    %c0_1 = arith.constant 0 : index
    %0 = vector.load %arg1[%c0, %c0_0, %c0_1] : memref<1x16x64xf32, #tpu.memory_space<vmem>>, vector<1x16x64xf32>
    %1 = vector.shape_cast %0 : vector<1x16x64xf32> to vector<16x64xf32>
    %2 = arith.truncf %1 : vector<16x64xf32> to vector<16x64xbf16>
    %cst = arith.constant 0.000000e+00 : bf16
    %3 = vector.broadcast %cst : bf16 to vector<1x64xbf16>
    %4 = vector.extract_strided_slice %2 {offsets = [0, 0], sizes = [15, 64], strides = [1, 1]} : vector<16x64xbf16> to vector<15x64xbf16>
    %5 = tpu.concatenate %3, %4 in 0 : vector<1x64xbf16>, vector<15x64xbf16> -> vector<16x64xbf16>
    %6 = vector.extract_strided_slice %2 {offsets = [1, 0], sizes = [15, 64], strides = [1, 1]} : vector<16x64xbf16> to vector<15x64xbf16>
    %7 = tpu.concatenate %6, %3 in 0 : vector<15x64xbf16>, vector<1x64xbf16> -> vector<16x64xbf16>
    %8 = tpu.concatenate %5, %2, %7 in 1 : vector<16x64xbf16>, vector<16x64xbf16>, vector<16x64xbf16> -> vector<16x192xbf16>
    %c0_2 = arith.constant 0 : index
    %c0_3 = arith.constant 0 : index
    %9 = vector.load %arg2[%c0_2, %c0_3] : memref<192x256xbf16, #tpu.memory_space<vmem>>, vector<192x256xbf16>
    %cst_4 = arith.constant dense<0.000000e+00> : vector<16x256xf32>
    %10 = tpu.matmul %8, %9, %cst_4 {dimension_numbers = #tpu.dot_dimension_numbers<[1], [0], [0], [1], [0, 0, 1, 1], [], []>} : vector<16x192xbf16>, vector<192x256xbf16>, vector<16x256xf32> -> vector<16x256xf32>
    %c0_5 = arith.constant 0 : index
    %c0_6 = arith.constant 0 : index
    %11 = vector.load %arg3[%c0_5, %c0_6] : memref<32x16xbf16, #tpu.memory_space<vmem>>, vector<32x16xbf16>
    %12 = arith.truncf %10 : vector<16x256xf32> to vector<16x256xbf16>
    %cst_7 = arith.constant dense<0.000000e+00> : vector<32x256xf32>
    %13 = tpu.matmul %11, %12, %cst_7 {dimension_numbers = #tpu.dot_dimension_numbers<[1], [0], [0], [1], [0, 0, 1, 1], [], []>} : vector<32x16xbf16>, vector<16x256xbf16>, vector<32x256xf32> -> vector<32x256xf32>
    %c0_8 = arith.constant 0 : index
    %c0_9 = arith.constant 0 : index
    %14 = vector.load %arg4[%c0_8, %c0_9] : memref<1x256xf32, #tpu.memory_space<vmem>>, vector<1x256xf32>
    %15 = vector.broadcast %14 : vector<1x256xf32> to vector<32x256xf32>
    %16 = arith.addf %13, %15 : vector<32x256xf32>
    %cst_10 = arith.constant 0.000000e+00 : f32
    %17 = vector.broadcast %cst_10 : f32 to vector<32x256xf32>
    %18 = arith.maximumf %16, %17 : vector<32x256xf32>
    %c0_11 = arith.constant 0 : index
    %c0_12 = arith.constant 0 : index
    %c0_13 = arith.constant 0 : index
    %19 = vector.load %arg5[%c0_11, %c0_12, %c0_13] : memref<1x32x256xf32, #tpu.memory_space<vmem>>, vector<1x32x256xf32>
    %20 = vector.shape_cast %19 : vector<1x32x256xf32> to vector<32x256xf32>
    %21 = vector.shape_cast %18 : vector<32x256xf32> to vector<1x32x256xf32>
    tpu.vector_store %arg5[%c0_11, %c0_12, %c0_13], %21 {strides = array<i32>} : memref<1x32x256xf32, #tpu.memory_space<vmem>>, vector<1x32x256xf32>,
    return
  }
  func.func @transform_0(%arg0: i32) -> (i32, i32, i32) {
    %c0_i32 = arith.constant 0 : i32
    %c0_i32_0 = arith.constant 0 : i32
    %c0_i32_1 = arith.constant 0 : i32
    return %arg0, %c0_i32, %c0_i32_0 : i32, i32, i32
  }
  func.func @transform_1(%arg0: i32) -> (i32, i32) {
    %c0_i32 = arith.constant 0 : i32
    %c0_i32_0 = arith.constant 0 : i32
    %c0_i32_1 = arith.constant 0 : i32
    return %c0_i32, %c0_i32_0 : i32, i32
  }
  func.func @transform_2(%arg0: i32) -> (i32, i32) {
    %c0_i32 = arith.constant 0 : i32
    %c0_i32_0 = arith.constant 0 : i32
    %c0_i32_1 = arith.constant 0 : i32
    return %c0_i32, %c0_i32_0 : i32, i32
  }
  func.func @transform_3(%arg0: i32) -> (i32, i32) {
    %c0_i32 = arith.constant 0 : i32
    %c0_i32_0 = arith.constant 0 : i32
    %c0_i32_1 = arith.constant 0 : i32
    return %c0_i32, %c0_i32_0 : i32, i32
  }
  func.func @transform_4(%arg0: i32) -> (i32, i32, i32) {
    %c0_i32 = arith.constant 0 : i32
    %c0_i32_0 = arith.constant 0 : i32
    %c0_i32_1 = arith.constant 0 : i32
    return %arg0, %c0_i32, %c0_i32_0 : i32, i32, i32
  }
}

</mosaic_0001>

<bundles_post_ra>
// kernel: tpu_custom_call.1
= control target key start
LH: loop header
LB: loop body
LE: loop exit
PB: predicated region body
PF: predicated region fallthrough
CT: control target
= control target key end

     0   :  { %9 = vsyncpa [#allocation3], 0  ;;  %s1154_s0 = inlined_call_operand.hbm [shape: f32[2,16,64], index: 0, kind: input, shape index: {}]   ;;  %s1155_s1 = inlined_call_operand.hbm [shape: bf16[192,256], index: 1, kind: input, shape index: {}]   ;;  %s1156_s2 = inlined_call_operand.vmem [shape: bf16[32,16], index: 2, kind: input, shape index: {}]   ;;  %s1157_s3 = inlined_call_operand.vmem [shape: f32[1,256], index: 3, kind: input, shape index: {}]   ;;  %s1158_s4 = inlined_call_operand.hbm [shape: f32[2,32,256], index: 4, kind: output, shape index: {}]  }
   0x1   :  { %11 = vsyncpa [#allocation3 + $0x1], 0 }
   0x2   :  { %12 = vsyncpa [#allocation6], 0 }
   0x3   :  { %13 = vsyncpa [#allocation4], 0 }
   0x4   :  { %15 = vsyncpa [#allocation4 + $0x1], 0  ;;  %s959_s15 = smov 0   ;;  %s961_s16 = smov 0  }
   0x5   :  { %s963_s17 = smov 0   ;;  %s965_s18 = smov 0  }
   0x6 LB: > { %s980_s19 = sadd.s32 4294967295, %s923_s18   ;;  %s653_s20 = sadd.s32 4294967294, %s923_s18   ;;  %s923_s18 = sphi %s965_s18, %s1180_s18   ;;  %s919_s17 = sphi %s963_s17, %s1179_s17   ;;  %s915_s16 = sphi %s961_s16, %s1178_s16   ;;  %s911_s15 = sphi %s959_s15, %s1177_s15  }
   0x7   : > { %p41_p0 = scmp.ne.s32.totalorder %s915_s16, %s911_s15  ;;  %p1159_p1 = scmp.eq.s32.totalorder %s980_s19, 0 }
   0x8   : > { %p134_p3 = scmp.eq.s32.totalorder %s653_s20, 1  ;;  %p654_p5 = scmp.ge.s32.totalorder %s923_s18, 1 }
   0x9   : > { %p989_p4 = por %p1159_p1, %p41_p0  ;;  %p141_p7 = scmp.lt.s32.totalorder %s923_s18, 3 }
   0xa   : > { %p994_p6 = por %p134_p3, %p41_p0  ;;  %s925_s24 = smov [#allocation5]  }
   0xb   : > { %s1163_s21 = scalar_select %p989_p4, 1, 0 }
   0xc   : > { %s1164_s22 = scalar_select %p994_p6, 1, 0 }
   0xd   : > { %p999_p8 = pnand %p654_p5, %p141_p7  ;;  %s153_s25 = sshll.u32 %s925_s24, 4  ;;  %s154_s25 = int_to_ptr.vmem [resolvable:$true] %s153_s25 }
   0xe   : > { %s1013_s27 = sadd.s32 1, %s923_s18   ;;  %s28_s28 = sadd.s32 1, %s919_s17 }
   0xf   : > { %s1165_s23 = scalar_select %p999_p8, 1, 0 }
  0x10   : > { %p708_p9 = pneg %p999_p8  ;;  %s25_s29 = ssub.s32 %s923_s18, %s1013_s27 }
  0x11   : > { %s812_s30 = scalar_lea.vmem %s154_s25, 3072  ;;  %p820_p5 = scmp.lt.s32.totalorder %s154_s25, %s154_s25 }
  0x12   : > { %p1008_p11 = pnand %p708_p9, %p1159_p1  ;;  %p813_p13 = scmp.ne.s32.totalorder %s154_s25, %s812_s30 }
  0x13   : > { %p821_p7 = scmp.lt.s32.totalorder %s812_s30, %s812_s30 }
  0x14   : > { %p803_p12 = pneg %p1008_p11 }
  0x15   : > { %p822_p10 = por %p821_p7, %p820_p5 }
  0x16   : > { %p815_p0 = pnand %p813_p13, %p803_p12 }
  0x18   : > { %p816_p3 = pneg %p815_p0 }
  0x1a   : > { %p823_p2 = pnand %p822_p10, %p816_p3 }
  0x1c   : > { %826 = shalt.err (!%p823_p2)
}
  0x1d   : > { %s926_s5 = smov 128   ;;  %s927_s6 = smov 8  }
  0x1e   : > { %711 = dma.hbm_to_vmem [thread:$0]  (!%p1008_p11), %s1155_s1, 3072, %s154_s25, [#allocation6], %s926_s5, %s926_s5, %s927_s6  }
  0x1f   : > { %p26_p2 = scmp.eq.s32.totalorder %s25_s29, 0  ;;  %p35_p9 = scmp.ne.s32.totalorder %s919_s17, %s915_s16 }
  0x20   : > { %p36_p10 = scmp.eq.s32.totalorder %s923_s18, 0  ;;  %p721_p12 = scmp.lt.s32.totalorder %s923_s18, 2 }
  0x21   : > { %s1033_s9 = scalar_select %p26_p2, %s919_s17, %s28_s28  }
  0x22   : > { %p37_p13 = por %p36_p10, %p35_p9  ;;  %p1167_p0 = scmp.eq.s32.totalorder %s980_s19, 1 }
  0x23   : > { %s173_s11 = sand.u32 1, %s919_s17   ;;  %s698_s12 = sshll.u32 %s923_s18, 8 }
  0x24   : > { %p1037_p3 = por %p1167_p0, %p35_p9  ;;  %s657_s13 = sshll.u32 %s173_s11, 4 }
  0x25   : > { %s1046_s24 = scalar_lea.hbm %s1154_s0, %s698_s12  ;;  %s177_s25 = scalar_lea.vmem [#allocation2], %s657_s13 }
  0x26   : > { %s1168_s10 = scalar_select %p1037_p3, 1, 0 }
  0x27   : > { %s184_s26 = sshll.u32 %s177_s25, 4  ;;  %p1048_p11 = pnand %p721_p12, %p37_p13  ;;  %s1052_s26 = int_to_ptr.vmem [resolvable:$true] %s184_s26 }
  0x28   : > { %s1054_s29 = scalar_lea.sflag [#allocation3], %s173_s11  ;;  %s827_s30 = scalar_lea.hbm %s1046_s24, 256 }
  0x29   : > { %p828_p5 = scmp.ne.s32.totalorder %s1046_s24, %s827_s30  ;;  %p829_p7 = pneg %p1048_p11 }
  0x2a   : > { %s832_s12 = scalar_lea.hbm %s1154_s0, 512  ;;  %p833_p10 = scmp.lt.s32.totalorder %s1046_s24, %s1154_s0 }
  0x2b   : > { %p830_p2 = pnand %p829_p7, %p828_p5  ;;  %p834_p12 = scmp.lt.s32.totalorder %s832_s12, %s827_s30 }
  0x2d   : > { %p831_p9 = pneg %p830_p2  ;;  %p835_p13 = por %p834_p12, %p833_p10 }
  0x2f   : > { %p836_p0 = pnand %p835_p13, %p831_p9 }
  0x31   : > { %839 = shalt.err (!%p836_p0)
}
  0x32   : > { %s840_s11 = scalar_lea.vmem %s1052_s26, 256  ;;  %s928_s20 = smov [#allocation2]  }
  0x33   : > { %p841_p1 = scmp.ne.s32.totalorder %s1052_s26, %s840_s11  ;;  %s845_s25 = sshll.u32 %s928_s20, 4  ;;  %s846_s25 = int_to_ptr.vmem [resolvable:$false] %s845_s25 }
  0x34   : > { %s847_s7 = scalar_lea.vmem %s846_s25, 512  ;;  %p848_p2 = scmp.lt.s32.totalorder %s1052_s26, %s846_s25 }
  0x35   : > { %p843_p6 = pnand %p841_p1, %p829_p7  ;;  %p849_p3 = scmp.lt.s32.totalorder %s847_s7, %s840_s11 }
  0x37   : > { %p844_p5 = pneg %p843_p6  ;;  %p850_p4 = por %p849_p3, %p848_p2 }
  0x39   : > { %p851_p8 = pnand %p850_p4, %p844_p5 }
  0x3b   : > { %854 = shalt.err (!%p851_p8)
}
  0x3c   : > { %715 = dma.hbm_to_vmem [thread:$0]  (!%p1048_p11), %s1046_s24, 256, %s1052_s26, %s1054_s29, %s926_s5, %s926_s5, %s927_s6  }
  0x3d   : > { %p1170_p1 = scmp.ne.s32.totalorder %s1165_s23, 0 }
  0x3e   : > { %s1081_s30 = sand.u32 (!%p1170_p1), 1, %s915_s16   ;;  %p1171_p4 = scmp.ne.s32.totalorder (!%p1170_p1), %s1163_s21, 0 }
  0x3f   : > { %196 = sbr.rel (%p1170_p1) target bundleno = 621 (0x26d), region = 36  ;;  %s661_s8 = sshll.u32 (!%p1170_p1), %s1081_s30, 4 }
  0x40   : > { %s199_s12 = scalar_lea.sflag (!%p1170_p1), [#allocation3], %s1081_s30  ;;  %s202_s13 = scalar_lea.vmem (!%p1170_p1), [#allocation2], %s661_s8 }
  0x44   : > { %898 = dma.done.wait (%p1171_p4), %s199_s12, 256  }
  0x45   : > { %900 = vsyncadd (%p1171_p4), %s199_s12, 4294967040  ;;  %p1172_p6 = scmp.eq.s32.totalorder %s980_s19, 0 }
  0x47   : > { %902 = dma.done.wait (%p1172_p6), [#allocation6], 3072   ;;  %p1173_p8 = pmov %p1172_p6 }
  0x48   : > { %v232_v0 = vld [vmem:[%s202_s13] sm:$0xff]  ;;  %v233_v1 = vld [vmem:[%s202_s13 + $0x8] sm:$0xff]  ;;  %s929_s23 = smov 64   ;;  %vm250_vm0 = vcmask 1047552   ;;  %vm251_vm1 = vsmask.f32 7424  ;;  %v460_v46 = vlaneseq }
  0x49   : > { %904 = vsyncadd (%p1173_p8), [#allocation6], 4294964224  ;;  %v234_v2 = vpack.c.bf16 %v233_v1, %v232_v0  ;;  %v763_v3 = vld [vmem:[#allocation5 + $0x74] ss:$8 sps:$4 sm:$0xff]   ;;  %v765_v4 = vld [vmem:[#allocation5 + $0x70] ss:$8 sps:$4 sm:$0xff]  }
  0x4a   : > { %v766_v5 = vld [vmem:[#allocation5 + $0x64] ss:$8 sps:$4 sm:$0xff]   ;;  %409 = vmatprep.subr.bf16.mxu0 %v763_v3  ;;  %v768_v8 = vld [vmem:[#allocation5 + $0x60] ss:$8 sps:$4 sm:$0xff]   ;;  %v769_v9 = vld [vmem:[#allocation5 + $0x54] ss:$8 sps:$4 sm:$0xff]  }
  0x4b   : > { %255 = vrot.lane.b32.xlu0 %v234_v2, %s929_s23  ;;  %v236_v6 = vshrl.u32 %v234_v2, 16  ;;  %v239_v7 = vshll.u32 %v234_v2, 16  ;;  %410 = vmatpush1.bf16.msra.mxu0 %v765_v4  ;;  %vm252_vm2 = vmand %vm250_vm0, %vm251_vm1  ;;  %v771_v13 = vld [vmem:[#allocation5 + $0x50] ss:$8 sps:$4 sm:$0xff]   ;;  %vm257_vm3 = vcmask 523264   ;;  %vm243_vm4 = vcmask 1040384  }
  0x4c   : > { %411 = vmatprep.subr.bf16.mxu0 %v766_v5  ;;  %v772_v15 = vld [vmem:[#allocation5 + $0x44] ss:$8 sps:$4 sm:$0xff]   ;;  %v774_v17 = vld [vmem:[#allocation5 + $0x40] ss:$8 sps:$4 sm:$0xff]   ;;  %v775_v18 = vld [vmem:[#allocation5 + $0x34] ss:$8 sps:$4 sm:$0xff]  }
  0x4d   : > { %v238_v10 = vrot.slane %v236_v6, 7  ;;  %v247_v11 = vrot.slane %v239_v7, 1  ;;  %v777_v19 = vld [vmem:[#allocation5 + $0x30] ss:$8 sps:$4 sm:$0xff]   ;;  %v778_v20 = vld [vmem:[#allocation5 + $0x24] ss:$8 sps:$4 sm:$0xff]  }
  0x4e   : > { %v780_v21 = vld [vmem:[#allocation5 + $0x20] ss:$8 sps:$4 sm:$0xff]   ;;  %v781_v22 = vld [vmem:[#allocation5 + $0x14] ss:$8 sps:$4 sm:$0xff]   ;;  %v783_v23 = vld [vmem:[#allocation5 + $0x10] ss:$8 sps:$4 sm:$0xff]  }
  0x4f   : > { %v241_v12 = vor.u32 %v239_v7, %v238_v10  ;;  %412 = vmatpush1.bf16.msra.mxu0 %v768_v8  ;;  %v248_v14 = vor.u32 %v247_v11, %v236_v6  ;;  %v784_v24 = vld [vmem:[#allocation5 + $0x4] ss:$8 sps:$4 sm:$0xff]   ;;  %v786_v25 = vld [vmem:[#allocation5] ss:$8 sps:$4 sm:$0xff]   ;;  %v787_v26 = vld [vmem:[#allocation5 + $0xb4] ss:$8 sps:$4 sm:$0xff]  }
  0x50   : > { %413 = vmatprep.subr.bf16.mxu0 %v769_v9  ;;  %v789_v27 = vld [vmem:[#allocation5 + $0xb0] ss:$8 sps:$4 sm:$0xff]   ;;  %v790_v28 = vld [vmem:[#allocation5 + $0xa4] ss:$8 sps:$4 sm:$0xff]   ;;  %v792_v29 = vld [vmem:[#allocation5 + $0xa0] ss:$8 sps:$4 sm:$0xff]  }
  0x51   : > { %v253_v16 = vsel %vm252_vm2, %v248_v14, 0  ;;  %v793_v30 = vld [vmem:[#allocation5 + $0x94] ss:$8 sps:$4 sm:$0xff]   ;;  %v795_v31 = vld [vmem:[#allocation5 + $0x90] ss:$8 sps:$4 sm:$0xff]   ;;  %v930_v37 = vmov 0  }
  0x52   : > { %688 = vmatprep.mubr.msk.bf16.mxu0 %vm257_vm3, %v253_v16  ;;  %v796_v32 = vld [vmem:[#allocation5 + $0x84] ss:$8 sps:$4 sm:$0xff]   ;;  %v798_v33 = vld [vmem:[#allocation5 + $0x80] ss:$8 sps:$4 sm:$0xff]   ;;  %vm244_vm5 = vsmask.f32 256  ;;  %519 = vmatprep.mubr.bf16.mxu1 %v930_v37 }
  0x53   : > { %414 = vmatpush1.bf16.msra.mxu0 %v771_v13  ;;  %vm245_vm6 = vmand %vm243_vm4, %vm244_vm5  ;;  %v799_v44 = vld [vmem:[%s1156_s2] sm:$0xff]   ;;  %vm480_vm7 = vcmask 130048   ;;  %v800_v45 = vld [vmem:[%s1156_s2 + $0x8] sm:$0xff]   ;;  %v461_v47 = vshrl.u32 %v460_v46, 7  ;;  %s663_s29 = sshll.u32 %s1081_s30, 6  ;;  %s699_s20 = sshll.u32 %s980_s19, 10 }
  0x54   : > { %415 = vmatprep.subr.bf16.mxu0 %v772_v15  ;;  %v246_v34 = vsel %vm245_vm6, 0, %v241_v12  ;;  %v458_v49 = vld [vmem:[%s1157_s3] sm:$0x3]  ;;  %s230_s14 = scalar_lea.vmem [#allocation7], %s663_s29  ;;  %s1111_s8 = scalar_lea.hbm %s1158_s4, %s699_s20 }
  0x55   : > { %v462_v48 = vsub.s32 0, %v461_v47  ;;  %v466_v50 = vsub.s32 1, %v461_v47  ;;  %s570_s11 = sshll.u32 %s230_s14, 4  ;;  %s557_s12 = scalar_lea.sflag [#allocation4], %s1081_s30  ;;  %s1106_s11 = int_to_ptr.vmem [resolvable:$true] %s570_s11 }
  0x56   : > { %s855_s13 = scalar_lea.vmem %s1106_s11, 1024  ;;  %p1174_p11 = scmp.ne.s32.totalorder %s1168_s10, 0 }
  0x57   : > { %416 = vmatpush1.bf16.msra.mxu0 %v774_v17  ;;  %v463_v51 = vrot.slane %v458_v49, %v462_v48  ;;  %v467_v52 = vrot.slane %v458_v49, %v466_v50  ;;  %p856_p3 = scmp.ne.s32.totalorder %s1106_s11, %s855_s13  ;;  %s931_s19 = smov [#allocation7]  }
  0x58   : > { %417 = vmatprep.subr.bf16.mxu0 %v775_v18  ;;  %s859_s23 = sshll.u32 %s931_s19, 4  ;;  %s860_s23 = int_to_ptr.vmem [resolvable:$false] %s859_s23 }
  0x59   : > { %p857_p7 = pnand %p856_p3, %p1174_p11  ;;  %s861_s21 = scalar_lea.vmem %s860_s23, 2048 }
  0x5a   : > { %p862_p10 = scmp.lt.s32.totalorder %s1106_s11, %s860_s23  ;;  %p863_p12 = scmp.lt.s32.totalorder %s861_s21, %s855_s13 }
  0x5b   : > { %418 = vmatpush1.bf16.msra.mxu0 %v777_v19  ;;  %p858_p9 = pneg %p857_p7 }
  0x5c   : > { %419 = vmatprep.subr.bf16.mxu0 %v778_v20  ;;  %p864_p13 = por %p863_p12, %p862_p10 }
  0x5e   : > { %p865_p0 = pnand %p864_p13, %p858_p9 }
  0x5f   : > { %420 = vmatpush1.bf16.msra.mxu0 %v780_v21 }
  0x60   : > { %421 = vmatprep.subr.bf16.mxu0 %v781_v22 }
  0x63   : > { %422 = vmatpush1.bf16.msra.mxu0 %v783_v23 }
  0x64   : > { %423 = vmatprep.subr.bf16.mxu0 %v784_v24 }
  0x67   : > { %424 = vmatpush1.bf16.msra.mxu0 %v786_v25 }
  0x68   : > { %433 = vmatprep.subr.bf16.mxu0 %v787_v26 }
  0x6b   : > { %434 = vmatpush2.bf16.msra.mxu0 %v789_v27 }
  0x6c   : > { %435 = vmatprep.subr.bf16.mxu0 %v790_v28 }
  0x6f   : > { %436 = vmatpush2.bf16.msra.mxu0 %v792_v29 }
  0x70   : > { %437 = vmatprep.subr.bf16.mxu0 %v793_v30 }
  0x73   : > { %438 = vmatpush2.bf16.msra.mxu0 %v795_v31 }
  0x74   : > { %439 = vmatprep.subr.bf16.mxu0 %v796_v32 }
  0x77   : > { %440 = vmatpush2.bf16.msra.mxu0 %v798_v33 }
  0xbd   : > { %v256_v35 = vpop.permute.xlu0 %255 }
  0xbe   : > { %v260_v36 = vsel %vm257_vm3, %v246_v34, %v256_v35 }
  0xbf   : > { %442 = vmatmul.mubr.bf16.vlgmr.msra.gmra.mxu0 %v260_v36 }
 0x17f   : > { %v443_v38 = vpop.f32.mrf.mxu0 }
 0x181   : > { %v445_v39 = vpop.f32.mrf.mxu0 }
 0x183   : > { %v447_v40 = vpop.f32.mrf.mxu0 }
 0x184   : > { %v456_v43 = vpack.c.bf16 %v447_v40, %v443_v38 }
 0x185   : > { %v449_v41 = vpop.f32.mrf.mxu0 }
 0x186   : > { %v457_v42 = vpack.c.bf16 %v449_v41, %v445_v39 }
 0x188   : > { %501 = vmatprep.subr.bf16.mxu1 %v457_v42 }
 0x189   : > { %502 = vmatpush1.bf16.msra.mxu1 %v456_v43 }
 0x18c   : > { %691 = vmatmul.mubr.msk.bf16.vlgmr.msra.gmra.mxu1 %vm480_vm7, %v799_v44 }
 0x18d   : > { %529 = vmatprep.mubr.bf16.mxu1 %v930_v37 }
 0x194   : > { %692 = vmatmul.mubr.msk.bf16.gmra.mxu1 %vm480_vm7, %v800_v45 }
 0x24c   : > { %v521_v53 = vpop.f32.mrf.mxu1 }
 0x24d   : > { %v522_v54 = vadd.f32 %v521_v53, %v463_v51 }
 0x24e   : > { %v523_v55 = vpop.f32.mrf.mxu1 }
 0x24f   : > { %v540_v56 = vmax.f32 %v522_v54, 0.0  ;;  %v524_v57 = vadd.f32 %v523_v55, %v467_v52 }
 0x250   : > { %v525_v58 = vpop.f32.mrf.mxu1 }
 0x251   : > { %548 = vst [vmem:[%s230_s14] sm:$0xff] %v540_v56  ;;  %v541_v59 = vmax.f32 %v524_v57, 0.0  ;;  %v526_v60 = vadd.f32 %v525_v58, %v463_v51 }
 0x252   : > { %v527_v61 = vpop.f32.mrf.mxu1 }
 0x253   : > { %549 = vst [vmem:[%s230_s14 + $0x8] sm:$0xff] %v541_v59  ;;  %v542_v62 = vmax.f32 %v526_v60, 0.0  ;;  %v528_v63 = vadd.f32 %v527_v61, %v467_v52 }
 0x254   : > { %v531_v0 = vpop.f32.mrf.mxu1 }
 0x255   : > { %550 = vst [vmem:[%s230_s14 + $0x10] sm:$0xff] %v542_v62  ;;  %v543_v1 = vmax.f32 %v528_v63, 0.0  ;;  %v532_v2 = vadd.f32 %v531_v0, %v463_v51 }
 0x256   : > { %v533_v3 = vpop.f32.mrf.mxu1 }
 0x257   : > { %551 = vst [vmem:[%s230_s14 + $0x18] sm:$0xff] %v543_v1  ;;  %v544_v4 = vmax.f32 %v532_v2, 0.0  ;;  %v534_v5 = vadd.f32 %v533_v3, %v467_v52 }
 0x258   : > { %v535_v6 = vpop.f32.mrf.mxu1 }
 0x259   : > { %552 = vst [vmem:[%s230_s14 + $0x20] sm:$0xff] %v544_v4  ;;  %v545_v7 = vmax.f32 %v534_v5, 0.0  ;;  %v536_v8 = vadd.f32 %v535_v6, %v463_v51 }
 0x25a   : > { %v537_v9 = vpop.f32.mrf.mxu1 }
 0x25b   : > { %553 = vst [vmem:[%s230_s14 + $0x28] sm:$0xff] %v545_v7  ;;  %v546_v10 = vmax.f32 %v536_v8, 0.0  ;;  %v538_v11 = vadd.f32 %v537_v9, %v467_v52 }
 0x25d   : > { %554 = vst [vmem:[%s230_s14 + $0x30] sm:$0xff] %v546_v10  ;;  %v547_v12 = vmax.f32 %v538_v11, 0.0 }
 0x25f   : > { %555 = vst [vmem:[%s230_s14 + $0x38] sm:$0xff] %v547_v12 }
 0x260   : > { %868 = shalt.err (!%p865_p0)
}
 0x261   : > { %s869_s5 = scalar_lea.hbm %s1111_s8, 1024  ;;  %s873_s26 = scalar_lea.hbm %s1158_s4, 2048 }
 0x262   : > { %p870_p5 = scmp.ne.s32.totalorder %s1111_s8, %s869_s5  ;;  %p874_p4 = scmp.lt.s32.totalorder %s1111_s8, %s1158_s4 }
 0x263   : > { %p875_p6 = scmp.lt.s32.totalorder %s873_s26, %s869_s5 }
 0x264   : > { %p871_p2 = pnand %p870_p5, %p1174_p11 }
 0x265   : > { %p876_p8 = por %p875_p6, %p874_p4 }
 0x266   : > { %p872_p1 = pneg %p871_p2 }
 0x268   : > { %p877_p3 = pnand %p876_p8, %p872_p1 }
 0x26a   : > { %880 = shalt.err (!%p877_p3)
}
 0x26b   : > { %s932_s14 = smov 256   ;;  %s933_s20 = smov 16  }
 0x26c   : > { %706 = dma.vmem_to_hbm [thread:$0]  (%p1174_p11), %s1106_s11, 1024, %s1111_s8, %s557_s12, %s932_s14, %s932_s14, %s933_s20  }
 0x26d PF: > { %s585_s25 = sand.u32 1, %s911_s15   ;;  %p1175_p7 = scmp.ne.s32.totalorder %s1164_s22, 0 }
 0x26e   : > { %p1176_p9 = scmp.ge.s32.totalorder %s923_s18, 2  ;;  %s586_s7 = scalar_lea.sflag [#allocation4], %s585_s25 }
 0x270   : > { %p717_p10 = pnand %p1176_p9, %p1175_p7 }
 0x272   : > { %p718_p12 = pneg %p717_p10 }
 0x274   : > { %906 = dma.done.wait (%p718_p12), %s586_s7, 1024  }
 0x275   : > { %908 = vsyncadd (%p718_p12), %s586_s7, 4294966272  ;;  %p18_p13 = scmp.ge.s32.totalorder %s1013_s27, 4   ;;  %s1177_s15 = smov %s915_s16 }
 0x276   : > { %s1178_s16 = smov %s919_s17  ;;  %s1179_s17 = smov %s1033_s9 }
 0x277   : > { %s1180_s18 = smov %s1013_s27  ;;  %20 = sbr.rel (!%p18_p13) target bundleno = 6 (0x6), region = 85 }
 0x27c   :  { %591 = vsyncpa [#allocation3], 1 }
 0x27d   :  { %593 = vsyncpa [#allocation3 + $0x1], 1 }
 0x27e   :  { %594 = vsyncpa [#allocation6], 1 }
 0x27f   :  { %595 = vsyncpa [#allocation4], 1 }
 0x280   :  { %597 = vsyncpa [#allocation4 + $0x1], 1 }

// kernel: tpu_custom_call.1
= control target key start
LH: loop header
LB: loop body
LE: loop exit
PB: predicated region body
PF: predicated region fallthrough
CT: control target
= control target key end

     0   :  { %9 = vsyncpa [#allocation3], 0  ;;  %s1154_s0 = inlined_call_operand.hbm [shape: f32[2,16,64], index: 0, kind: input, shape index: {}]   ;;  %s1155_s1 = inlined_call_operand.hbm [shape: bf16[192,256], index: 1, kind: input, shape index: {}]   ;;  %s1156_s2 = inlined_call_operand.vmem [shape: bf16[32,16], index: 2, kind: input, shape index: {}]   ;;  %s1157_s3 = inlined_call_operand.vmem [shape: f32[1,256], index: 3, kind: input, shape index: {}]   ;;  %s1158_s4 = inlined_call_operand.hbm [shape: f32[2,32,256], index: 4, kind: output, shape index: {}]  }
   0x1   :  { %11 = vsyncpa [#allocation3 + $0x1], 0 }
   0x2   :  { %12 = vsyncpa [#allocation6], 0 }
   0x3   :  { %13 = vsyncpa [#allocation4], 0 }
   0x4   :  { %15 = vsyncpa [#allocation4 + $0x1], 0  ;;  %s959_s15 = smov 0   ;;  %s961_s16 = smov 0  }
   0x5   :  { %s963_s17 = smov 0   ;;  %s965_s18 = smov 0  }
   0x6 LB: > { %s980_s19 = sadd.s32 4294967295, %s923_s18   ;;  %s653_s20 = sadd.s32 4294967294, %s923_s18   ;;  %s923_s18 = sphi %s965_s18, %s1180_s18   ;;  %s919_s17 = sphi %s963_s17, %s1179_s17   ;;  %s915_s16 = sphi %s961_s16, %s1178_s16   ;;  %s911_s15 = sphi %s959_s15, %s1177_s15  }
   0x7   : > { %p41_p0 = scmp.ne.s32.totalorder %s915_s16, %s911_s15  ;;  %p1159_p1 = scmp.eq.s32.totalorder %s980_s19, 0 }
   0x8   : > { %p134_p3 = scmp.eq.s32.totalorder %s653_s20, 1  ;;  %p654_p5 = scmp.ge.s32.totalorder %s923_s18, 1 }
   0x9   : > { %p989_p4 = por %p1159_p1, %p41_p0  ;;  %p141_p7 = scmp.lt.s32.totalorder %s923_s18, 3 }
   0xa   : > { %p994_p6 = por %p134_p3, %p41_p0  ;;  %s925_s24 = smov [#allocation5]  }
   0xb   : > { %s1163_s21 = scalar_select %p989_p4, 1, 0 }
   0xc   : > { %s1164_s22 = scalar_select %p994_p6, 1, 0 }
   0xd   : > { %p999_p8 = pnand %p654_p5, %p141_p7  ;;  %s153_s25 = sshll.u32 %s925_s24, 4  ;;  %s154_s25 = int_to_ptr.vmem [resolvable:$true] %s153_s25 }
   0xe   : > { %s1013_s27 = sadd.s32 1, %s923_s18   ;;  %s28_s28 = sadd.s32 1, %s919_s17 }
   0xf   : > { %s1165_s23 = scalar_select %p999_p8, 1, 0 }
  0x10   : > { %p708_p9 = pneg %p999_p8  ;;  %s25_s29 = ssub.s32 %s923_s18, %s1013_s27 }
  0x11   : > { %s812_s30 = scalar_lea.vmem %s154_s25, 3072  ;;  %p820_p5 = scmp.lt.s32.totalorder %s154_s25, %s154_s25 }
  0x12   : > { %p1008_p11 = pnand %p708_p9, %p1159_p1  ;;  %p813_p13 = scmp.ne.s32.totalorder %s154_s25, %s812_s30 }
  0x13   : > { %p821_p7 = scmp.lt.s32.totalorder %s812_s30, %s812_s30 }
  0x14   : > { %p803_p12 = pneg %p1008_p11 }
  0x15   : > { %p822_p10 = por %p821_p7, %p820_p5 }
  0x16   : > { %p815_p0 = pnand %p813_p13, %p803_p12 }
  0x18   : > { %p816_p3 = pneg %p815_p0 }
  0x1a   : > { %p823_p2 = pnand %p822_p10, %p816_p3 }
  0x1c   : > { %826 = shalt.err (!%p823_p2)
}
  0x1d   : > { %s926_s5 = smov 128   ;;  %s927_s6 = smov 8  }
  0x1e   : > { %711 = dma.hbm_to_vmem [thread:$0]  (!%p1008_p11), %s1155_s1, 3072, %s154_s25, [#allocation6], %s926_s5, %s926_s5, %s927_s6  }
  0x1f   : > { %p26_p2 = scmp.eq.s32.totalorder %s25_s29, 0  ;;  %p35_p9 = scmp.ne.s32.totalorder %s919_s17, %s915_s16 }
  0x20   : > { %p36_p10 = scmp.eq.s32.totalorder %s923_s18, 0  ;;  %p721_p12 = scmp.lt.s32.totalorder %s923_s18, 2 }
  0x21   : > { %s1033_s9 = scalar_select %p26_p2, %s919_s17, %s28_s28  }
  0x22   : > { %p37_p13 = por %p36_p10, %p35_p9  ;;  %p1167_p0 = scmp.eq.s32.totalorder %s980_s19, 1 }
  0x23   : > { %s173_s11 = sand.u32 1, %s919_s17   ;;  %s698_s12 = sshll.u32 %s923_s18, 8 }
  0x24   : > { %p1037_p3 = por %p1167_p0, %p35_p9  ;;  %s657_s13 = sshll.u32 %s173_s11, 4 }
  0x25   : > { %s1046_s24 = scalar_lea.hbm %s1154_s0, %s698_s12  ;;  %s177_s25 = scalar_lea.vmem [#allocation2], %s657_s13 }
  0x26   : > { %s1168_s10 = scalar_select %p1037_p3, 1, 0 }
  0x27   : > { %s184_s26 = sshll.u32 %s177_s25, 4  ;;  %p1048_p11 = pnand %p721_p12, %p37_p13  ;;  %s1052_s26 = int_to_ptr.vmem [resolvable:$true] %s184_s26 }
  0x28   : > { %s1054_s29 = scalar_lea.sflag [#allocation3], %s173_s11  ;;  %s827_s30 = scalar_lea.hbm %s1046_s24, 256 }
  0x29   : > { %p828_p5 = scmp.ne.s32.totalorder %s1046_s24, %s827_s30  ;;  %p829_p7 = pneg %p1048_p11 }
  0x2a   : > { %s832_s12 = scalar_lea.hbm %s1154_s0, 512  ;;  %p833_p10 = scmp.lt.s32.totalorder %s1046_s24, %s1154_s0 }
  0x2b   : > { %p830_p2 = pnand %p829_p7, %p828_p5  ;;  %p834_p12 = scmp.lt.s32.totalorder %s832_s12, %s827_s30 }
  0x2d   : > { %p831_p9 = pneg %p830_p2  ;;  %p835_p13 = por %p834_p12, %p833_p10 }
  0x2f   : > { %p836_p0 = pnand %p835_p13, %p831_p9 }
  0x31   : > { %839 = shalt.err (!%p836_p0)
}
  0x32   : > { %s840_s11 = scalar_lea.vmem %s1052_s26, 256  ;;  %s928_s20 = smov [#allocation2]  }
  0x33   : > { %p841_p1 = scmp.ne.s32.totalorder %s1052_s26, %s840_s11  ;;  %s845_s25 = sshll.u32 %s928_s20, 4  ;;  %s846_s25 = int_to_ptr.vmem [resolvable:$false] %s845_s25 }
  0x34   : > { %s847_s7 = scalar_lea.vmem %s846_s25, 512  ;;  %p848_p2 = scmp.lt.s32.totalorder %s1052_s26, %s846_s25 }
  0x35   : > { %p843_p6 = pnand %p841_p1, %p829_p7  ;;  %p849_p3 = scmp.lt.s32.totalorder %s847_s7, %s840_s11 }
  0x37   : > { %p844_p5 = pneg %p843_p6  ;;  %p850_p4 = por %p849_p3, %p848_p2 }
  0x39   : > { %p851_p8 = pnand %p850_p4, %p844_p5 }
  0x3b   : > { %854 = shalt.err (!%p851_p8)
}
  0x3c   : > { %715 = dma.hbm_to_vmem [thread:$0]  (!%p1048_p11), %s1046_s24, 256, %s1052_s26, %s1054_s29, %s926_s5, %s926_s5, %s927_s6  }
  0x3d   : > { %p1170_p1 = scmp.ne.s32.totalorder %s1165_s23, 0 }
  0x3e   : > { %s1081_s30 = sand.u32 (!%p1170_p1), 1, %s915_s16   ;;  %p1171_p4 = scmp.ne.s32.totalorder (!%p1170_p1), %s1163_s21, 0 }
  0x3f   : > { %196 = sbr.rel (%p1170_p1) target bundleno = 621 (0x26d), region = 36  ;;  %s661_s8 = sshll.u32 (!%p1170_p1), %s1081_s30, 4 }
  0x40   : > { %s199_s12 = scalar_lea.sflag (!%p1170_p1), [#allocation3], %s1081_s30  ;;  %s202_s13 = scalar_lea.vmem (!%p1170_p1), [#allocation2], %s661_s8 }
  0x44   : > { %898 = dma.done.wait (%p1171_p4), %s199_s12, 256  }
  0x45   : > { %900 = vsyncadd (%p1171_p4), %s199_s12, 4294967040  ;;  %p1172_p6 = scmp.eq.s32.totalorder %s980_s19, 0 }
  0x47   : > { %902 = dma.done.wait (%p1172_p6), [#allocation6], 3072   ;;  %p1173_p8 = pmov %p1172_p6 }
  0x48   : > { %v232_v0 = vld [vmem:[%s202_s13] sm:$0xff]  ;;  %v233_v1 = vld [vmem:[%s202_s13 + $0x8] sm:$0xff]  ;;  %s929_s23 = smov 64   ;;  %vm250_vm0 = vcmask 1047552   ;;  %vm251_vm1 = vsmask.f32 7424  ;;  %v460_v46 = vlaneseq }
  0x49   : > { %904 = vsyncadd (%p1173_p8), [#allocation6], 4294964224  ;;  %v234_v2 = vpack.c.bf16 %v233_v1, %v232_v0  ;;  %v763_v3 = vld [vmem:[#allocation5 + $0x74] ss:$8 sps:$4 sm:$0xff]   ;;  %v765_v4 = vld [vmem:[#allocation5 + $0x70] ss:$8 sps:$4 sm:$0xff]  }
  0x4a   : > { %v766_v5 = vld [vmem:[#allocation5 + $0x64] ss:$8 sps:$4 sm:$0xff]   ;;  %409 = vmatprep.subr.bf16.mxu0 %v763_v3  ;;  %v768_v8 = vld [vmem:[#allocation5 + $0x60] ss:$8 sps:$4 sm:$0xff]   ;;  %v769_v9 = vld [vmem:[#allocation5 + $0x54] ss:$8 sps:$4 sm:$0xff]  }
  0x4b   : > { %255 = vrot.lane.b32.xlu0 %v234_v2, %s929_s23  ;;  %v236_v6 = vshrl.u32 %v234_v2, 16  ;;  %v239_v7 = vshll.u32 %v234_v2, 16  ;;  %410 = vmatpush1.bf16.msra.mxu0 %v765_v4  ;;  %vm252_vm2 = vmand %vm250_vm0, %vm251_vm1  ;;  %v771_v13 = vld [vmem:[#allocation5 + $0x50] ss:$8 sps:$4 sm:$0xff]   ;;  %vm257_vm3 = vcmask 523264   ;;  %vm243_vm4 = vcmask 1040384  }
  0x4c   : > { %411 = vmatprep.subr.bf16.mxu0 %v766_v5  ;;  %v772_v15 = vld [vmem:[#allocation5 + $0x44] ss:$8 sps:$4 sm:$0xff]   ;;  %v774_v17 = vld [vmem:[#allocation5 + $0x40] ss:$8 sps:$4 sm:$0xff]   ;;  %v775_v18 = vld [vmem:[#allocation5 + $0x34] ss:$8 sps:$4 sm:$0xff]  }
  0x4d   : > { %v238_v10 = vrot.slane %v236_v6, 7  ;;  %v247_v11 = vrot.slane %v239_v7, 1  ;;  %v777_v19 = vld [vmem:[#allocation5 + $0x30] ss:$8 sps:$4 sm:$0xff]   ;;  %v778_v20 = vld [vmem:[#allocation5 + $0x24] ss:$8 sps:$4 sm:$0xff]  }
  0x4e   : > { %v780_v21 = vld [vmem:[#allocation5 + $0x20] ss:$8 sps:$4 sm:$0xff]   ;;  %v781_v22 = vld [vmem:[#allocation5 + $0x14] ss:$8 sps:$4 sm:$0xff]   ;;  %v783_v23 = vld [vmem:[#allocation5 + $0x10] ss:$8 sps:$4 sm:$0xff]  }
  0x4f   : > { %v241_v12 = vor.u32 %v239_v7, %v238_v10  ;;  %412 = vmatpush1.bf16.msra.mxu0 %v768_v8  ;;  %v248_v14 = vor.u32 %v247_v11, %v236_v6  ;;  %v784_v24 = vld [vmem:[#allocation5 + $0x4] ss:$8 sps:$4 sm:$0xff]   ;;  %v786_v25 = vld [vmem:[#allocation5] ss:$8 sps:$4 sm:$0xff]   ;;  %v787_v26 = vld [vmem:[#allocation5 + $0xb4] ss:$8 sps:$4 sm:$0xff]  }
  0x50   : > { %413 = vmatprep.subr.bf16.mxu0 %v769_v9  ;;  %v789_v27 = vld [vmem:[#allocation5 + $0xb0] ss:$8 sps:$4 sm:$0xff]   ;;  %v790_v28 = vld [vmem:[#allocation5 + $0xa4] ss:$8 sps:$4 sm:$0xff]   ;;  %v792_v29 = vld [vmem:[#allocation5 + $0xa0] ss:$8 sps:$4 sm:$0xff]  }
  0x51   : > { %v253_v16 = vsel %vm252_vm2, %v248_v14, 0  ;;  %v793_v30 = vld [vmem:[#allocation5 + $0x94] ss:$8 sps:$4 sm:$0xff]   ;;  %v795_v31 = vld [vmem:[#allocation5 + $0x90] ss:$8 sps:$4 sm:$0xff]   ;;  %v930_v37 = vmov 0  }
  0x52   : > { %688 = vmatprep.mubr.msk.bf16.mxu0 %vm257_vm3, %v253_v16  ;;  %v796_v32 = vld [vmem:[#allocation5 + $0x84] ss:$8 sps:$4 sm:$0xff]   ;;  %v798_v33 = vld [vmem:[#allocation5 + $0x80] ss:$8 sps:$4 sm:$0xff]   ;;  %vm244_vm5 = vsmask.f32 256  ;;  %519 = vmatprep.mubr.bf16.mxu1 %v930_v37 }
  0x53   : > { %414 = vmatpush1.bf16.msra.mxu0 %v771_v13  ;;  %vm245_vm6 = vmand %vm243_vm4, %vm244_vm5  ;;  %v799_v44 = vld [vmem:[%s1156_s2] sm:$0xff]   ;;  %vm480_vm7 = vcmask 130048   ;;  %v800_v45 = vld [vmem:[%s1156_s2 + $0x8] sm:$0xff]   ;;  %v461_v47 = vshrl.u32 %v460_v46, 7  ;;  %s663_s29 = sshll.u32 %s1081_s30, 6  ;;  %s699_s20 = sshll.u32 %s980_s19, 10 }
  0x54   : > { %415 = vmatprep.subr.bf16.mxu0 %v772_v15  ;;  %v246_v34 = vsel %vm245_vm6, 0, %v241_v12  ;;  %v458_v49 = vld [vmem:[%s1157_s3] sm:$0x3]  ;;  %s230_s14 = scalar_lea.vmem [#allocation7], %s663_s29  ;;  %s1111_s8 = scalar_lea.hbm %s1158_s4, %s699_s20 }
  0x55   : > { %v462_v48 = vsub.s32 0, %v461_v47  ;;  %v466_v50 = vsub.s32 1, %v461_v47  ;;  %s570_s11 = sshll.u32 %s230_s14, 4  ;;  %s557_s12 = scalar_lea.sflag [#allocation4], %s1081_s30  ;;  %s1106_s11 = int_to_ptr.vmem [resolvable:$true] %s570_s11 }
  0x56   : > { %s855_s13 = scalar_lea.vmem %s1106_s11, 1024  ;;  %p1174_p11 = scmp.ne.s32.totalorder %s1168_s10, 0 }
  0x57   : > { %416 = vmatpush1.bf16.msra.mxu0 %v774_v17  ;;  %v463_v51 = vrot.slane %v458_v49, %v462_v48  ;;  %v467_v52 = vrot.slane %v458_v49, %v466_v50  ;;  %p856_p3 = scmp.ne.s32.totalorder %s1106_s11, %s855_s13  ;;  %s931_s19 = smov [#allocation7]  }
  0x58   : > { %417 = vmatprep.subr.bf16.mxu0 %v775_v18  ;;  %s859_s23 = sshll.u32 %s931_s19, 4  ;;  %s860_s23 = int_to_ptr.vmem [resolvable:$false] %s859_s23 }
  0x59   : > { %p857_p7 = pnand %p856_p3, %p1174_p11  ;;  %s861_s21 = scalar_lea.vmem %s860_s23, 2048 }
  0x5a   : > { %p862_p10 = scmp.lt.s32.totalorder %s1106_s11, %s860_s23  ;;  %p863_p12 = scmp.lt.s32.totalorder %s861_s21, %s855_s13 }
  0x5b   : > { %418 = vmatpush1.bf16.msra.mxu0 %v777_v19  ;;  %p858_p9 = pneg %p857_p7 }
  0x5c   : > { %419 = vmatprep.subr.bf16.mxu0 %v778_v20  ;;  %p864_p13 = por %p863_p12, %p862_p10 }
  0x5e   : > { %p865_p0 = pnand %p864_p13, %p858_p9 }
  0x5f   : > { %420 = vmatpush1.bf16.msra.mxu0 %v780_v21 }
  0x60   : > { %421 = vmatprep.subr.bf16.mxu0 %v781_v22 }
  0x63   : > { %422 = vmatpush1.bf16.msra.mxu0 %v783_v23 }
  0x64   : > { %423 = vmatprep.subr.bf16.mxu0 %v784_v24 }
  0x67   : > { %424 = vmatpush1.bf16.msra.mxu0 %v786_v25 }
  0x68   : > { %433 = vmatprep.subr.bf16.mxu0 %v787_v26 }
  0x6b   : > { %434 = vmatpush2.bf16.msra.mxu0 %v789_v27 }
  0x6c   : > { %435 = vmatprep.subr.bf16.mxu0 %v790_v28 }
  0x6f   : > { %436 = vmatpush2.bf16.msra.mxu0 %v792_v29 }
  0x70   : > { %437 = vmatprep.subr.bf16.mxu0 %v793_v30 }
  0x73   : > { %438 = vmatpush2.bf16.msra.mxu0 %v795_v31 }
  0x74   : > { %439 = vmatprep.subr.bf16.mxu0 %v796_v32 }
  0x77   : > { %440 = vmatpush2.bf16.msra.mxu0 %v798_v33 }
  0xbd   : > { %v256_v35 = vpop.permute.xlu0 %255 }
  0xbe   : > { %v260_v36 = vsel %vm257_vm3, %v246_v34, %v256_v35 }
  0xbf   : > { %442 = vmatmul.mubr.bf16.vlgmr.msra.gmra.mxu0 %v260_v36 }
 0x17f   : > { %v443_v38 = vpop.f32.mrf.mxu0 }
 0x181   : > { %v445_v39 = vpop.f32.mrf.mxu0 }
 0x183   : > { %v447_v40 = vpop.f32.mrf.mxu0 }
 0x184   : > { %v456_v43 = vpack.c.bf16 %v447_v40, %v443_v38 }
 0x185   : > { %v449_v41 = vpop.f32.mrf.mxu0 }
 0x186   : > { %v457_v42 = vpack.c.bf16 %v449_v41, %v445_v39 }
 0x188   : > { %501 = vmatprep.subr.bf16.mxu1 %v457_v42 }
 0x189   : > { %502 = vmatpush1.bf16.msra.mxu1 %v456_v43 }
 0x18c   : > { %691 = vmatmul.mubr.msk.bf16.vlgmr.msra.gmra.mxu1 %vm480_vm7, %v799_v44 }
 0x18d   : > { %529 = vmatprep.mubr.bf16.mxu1 %v930_v37 }
 0x194   : > { %692 = vmatmul.mubr.msk.bf16.gmra.mxu1 %vm480_vm7, %v800_v45 }
 0x24c   : > { %v521_v53 = vpop.f32.mrf.mxu1 }
 0x24d   : > { %v522_v54 = vadd.f32 %v521_v53, %v463_v51 }
 0x24e   : > { %v523_v55 = vpop.f32.mrf.mxu1 }
 0x24f   : > { %v540_v56 = vmax.f32 %v522_v54, 0.0  ;;  %v524_v57 = vadd.f32 %v523_v55, %v467_v52 }
 0x250   : > { %v525_v58 = vpop.f32.mrf.mxu1 }
 0x251   : > { %548 = vst [vmem:[%s230_s14] sm:$0xff] %v540_v56  ;;  %v541_v59 = vmax.f32 %v524_v57, 0.0  ;;  %v526_v60 = vadd.f32 %v525_v58, %v463_v51 }
 0x252   : > { %v527_v61 = vpop.f32.mrf.mxu1 }
 0x253   : > { %549 = vst [vmem:[%s230_s14 + $0x8] sm:$0xff] %v541_v59  ;;  %v542_v62 = vmax.f32 %v526_v60, 0.0  ;;  %v528_v63 = vadd.f32 %v527_v61, %v467_v52 }
 0x254   : > { %v531_v0 = vpop.f32.mrf.mxu1 }
 0x255   : > { %550 = vst [vmem:[%s230_s14 + $0x10] sm:$0xff] %v542_v62  ;;  %v543_v1 = vmax.f32 %v528_v63, 0.0  ;;  %v532_v2 = vadd.f32 %v531_v0, %v463_v51 }
 0x256   : > { %v533_v3 = vpop.f32.mrf.mxu1 }
 0x257   : > { %551 = vst [vmem:[%s230_s14 + $0x18] sm:$0xff] %v543_v1  ;;  %v544_v4 = vmax.f32 %v532_v2, 0.0  ;;  %v534_v5 = vadd.f32 %v533_v3, %v467_v52 }
 0x258   : > { %v535_v6 = vpop.f32.mrf.mxu1 }
 0x259   : > { %552 = vst [vmem:[%s230_s14 + $0x20] sm:$0xff] %v544_v4  ;;  %v545_v7 = vmax.f32 %v534_v5, 0.0  ;;  %v536_v8 = vadd.f32 %v535_v6, %v463_v51 }
 0x25a   : > { %v537_v9 = vpop.f32.mrf.mxu1 }
 0x25b   : > { %553 = vst [vmem:[%s230_s14 + $0x28] sm:$0xff] %v545_v7  ;;  %v546_v10 = vmax.f32 %v536_v8, 0.0  ;;  %v538_v11 = vadd.f32 %v537_v9, %v467_v52 }
 0x25d   : > { %554 = vst [vmem:[%s230_s14 + $0x30] sm:$0xff] %v546_v10  ;;  %v547_v12 = vmax.f32 %v538_v11, 0.0 }
 0x25f   : > { %555 = vst [vmem:[%s230_s14 + $0x38] sm:$0xff] %v547_v12 }
 0x260   : > { %868 = shalt.err (!%p865_p0)
}
 0x261   : > { %s869_s5 = scalar_lea.hbm %s1111_s8, 1024  ;;  %s873_s26 = scalar_lea.hbm %s1158_s4, 2048 }
 0x262   : > { %p870_p5 = scmp.ne.s32.totalorder %s1111_s8, %s869_s5  ;;  %p874_p4 = scmp.lt.s32.totalorder %s1111_s8, %s1158_s4 }
 0x263   : > { %p875_p6 = scmp.lt.s32.totalorder %s873_s26, %s869_s5 }
 0x264   : > { %p871_p2 = pnand %p870_p5, %p1174_p11 }
 0x265   : > { %p876_p8 = por %p875_p6, %p874_p4 }
 0x266   : > { %p872_p1 = pneg %p871_p2 }
 0x268   : > { %p877_p3 = pnand %p876_p8, %p872_p1 }
 0x26a   : > { %880 = shalt.err (!%p877_p3)
}
 0x26b   : > { %s932_s14 = smov 256   ;;  %s933_s20 = smov 16  }
 0x26c   : > { %706 = dma.vmem_to_hbm [thread:$0]  (%p1174_p11), %s1106_s11, 1024, %s1111_s8, %s557_s12, %s932_s14, %s932_s14, %s933_s20  }
 0x26d PF: > { %s585_s25 = sand.u32 1, %s911_s15   ;;  %p1175_p7 = scmp.ne.s32.totalorder %s1164_s22, 0 }
 0x26e   : > { %p1176_p9 = scmp.ge.s32.totalorder %s923_s18, 2  ;;  %s586_s7 = scalar_lea.sflag [#allocation4], %s585_s25 }
 0x270   : > { %p717_p10 = pnand %p1176_p9, %p1175_p7 }
 0x272   : > { %p718_p12 = pneg %p717_p10 }
 0x274   : > { %906 = dma.done.wait (%p718_p12), %s586_s7, 1024  }
 0x275   : > { %908 = vsyncadd (%p718_p12), %s586_s7, 4294966272  ;;  %p18_p13 = scmp.ge.s32.totalorder %s1013_s27, 4   ;;  %s1177_s15 = smov %s915_s16 }
 0x276   : > { %s1178_s16 = smov %s919_s17  ;;  %s1179_s17 = smov %s1033_s9 }
 0x277   : > { %s1180_s18 = smov %s1013_s27  ;;  %20 = sbr.rel (!%p18_p13) target bundleno = 6 (0x6), region = 85 }
 0x27c   :  { %591 = vsyncpa [#allocation3], 1 }
 0x27d   :  { %593 = vsyncpa [#allocation3 + $0x1], 1 }
 0x27e   :  { %594 = vsyncpa [#allocation6], 1 }
 0x27f   :  { %595 = vsyncpa [#allocation4], 1 }
 0x280   :  { %597 = vsyncpa [#allocation4 + $0x1], 1 }

</bundles_post_ra>
